<compile_context>
chip_gen: v7x
topology: tpu7x:2x2x1
jax: 0.10.0
libtpu: 0.0.40
codegen_flags: <defaults>
</compile_context>

<pallas_src>
import jax
import jax.numpy as jnp
from jax.experimental import pallas as pl
from jax.experimental.pallas import tpu as pltpu

LANE = 128


def odefunc_kernel(t_ref, w1_ref, b1_ref, w2_ref, b2_ref, w3_ref, b3_ref, o_ref):
    # Layer 1: degenerate K=1 contraction -> pure VPU broadcast (no MXU).
    #   (TB,1) * (1,H) + (1,H) -> (TB,H)
    x = jnp.sin(t_ref[...] * w1_ref[...] + b1_ref[...])

    # Layer 2 on MXU: (TB,H) @ (H,H) + (1,H)
    x = jnp.dot(x, w2_ref[...], preferred_element_type=jnp.float32)
    x = jnp.sin(x + b2_ref[...])

    # Output layer fused immediately after layer 2 (same MXU window), with the
    # output dim zero-padded to a full 128-lane tile so the store below is a
    # lane-dense, unmasked vst:
    #   (TB,H) @ (H,OP) + (1,OP)
    y = jnp.dot(x, w3_ref[...], preferred_element_type=jnp.float32)
    o_ref[...] = (y + b3_ref[...]).astype(o_ref.dtype)


def odefunc_reference(t, p):
    """Pure-JAX reference (also used as the fused-XLA small-batch path)."""
    x = jnp.sin(t @ p["w1"] + p["b1"])
    x = jnp.sin(x @ p["w2"] + p["b2"])
    return x @ p["w3"] + p["b3"]


def odefunc_forward(t, params, *, block_b=2048, min_pallas_batch=256):
    """Forward pass.

    t: (B, 1) float32 time points.
    params: dict with transposed weights w1 (1,H), w2 (H,H), w3 (H,O) and
            2-D biases b1/b2 (1,H), b3 (1,O).
    block_b: max batch-tile rows per grid step (VMEM-safe on v5e/v6e/v7x).
    min_pallas_batch: batches smaller than this use the fused-XLA reference
            (the kernel's fixed dispatch cost can't be recovered there).
    """
    B = t.shape[0]
    O = params["w3"].shape[1]

    # Small-batch fallback: tiny ODE-RHS calls are strictly faster fused in XLA.
    if B < min_pallas_batch:
        return odefunc_reference(t, params)

    # Lane-dense output: pad the output feature dim to a multiple of 128 lanes.
    OP = ((O + LANE - 1) // LANE) * LANE
    w3p = jnp.pad(params["w3"], ((0, 0), (0, OP - O)))
    b3p = jnp.pad(params["b3"], ((0, 0), (0, OP - O)))

    # Batch tile: whole (8-aligned) batch in one grid step when it fits,
    # otherwise block_b-row tiles.  Padded rows are sliced off at the end
    # (sin is bounded, so padding with zeros is safe).
    tb = min(block_b, max(8, ((B + 7) // 8) * 8))
    Bp = ((B + tb - 1) // tb) * tb
    if Bp != B:
        t = jnp.pad(t, ((0, Bp - B), (0, 0)))

    # Weights/biases: full-array blocks with a constant index_map so they are
    # fetched once and stay resident in VMEM across all grid steps (~20 KB).
    resident = lambda arr: pl.BlockSpec(arr.shape, lambda i: (0, 0))

    out = pl.pallas_call(
        odefunc_kernel,
        out_shape=jax.ShapeDtypeStruct((Bp, OP), jnp.float32),
        grid=(Bp // tb,),
        in_specs=[
            pl.BlockSpec((tb, 1), lambda i: (i, 0)),      # t: tiled over batch
            resident(params["w1"]),
            resident(params["b1"]),
            resident(params["w2"]),
            resident(params["b2"]),
            resident(w3p),
            resident(b3p),
        ],
        out_specs=pl.BlockSpec((tb, OP), lambda i: (i, 0)),  # lane-dense block
        compiler_params=pltpu.CompilerParams(
            dimension_semantics=("arbitrary",),
            vmem_limit_bytes=32 * 1024 * 1024,
        ),
    )(t, params["w1"], params["b1"], params["w2"], params["b2"], w3p, b3p)

    return out[:B, :O]


def init_params(key, hidden_dim, output_dim):
    """Deterministic init mimicking nn.Linear's U(-1/sqrt(fan_in), 1/sqrt(fan_in))."""
    ks = jax.random.split(key, 6)

    def lin(kw, kb, fan_in, fan_out):
        bound = 1.0 / jnp.sqrt(jnp.float32(fan_in))
        # stored as (in, out) so forward is x @ W + b
        w = jax.random.uniform(kw, (fan_in, fan_out), jnp.float32, -bound, bound)
        b = jax.random.uniform(kb, (1, fan_out), jnp.float32, -bound, bound)
        return w, b

    w1, b1 = lin(ks[0], ks[1], 1, hidden_dim)
    w2, b2 = lin(ks[2], ks[3], hidden_dim, hidden_dim)
    w3, b3 = lin(ks[4], ks[5], hidden_dim, output_dim)
    return {"w1": w1, "b1": b1, "w2": w2, "b2": b2, "w3": w3, "b3": b3}


if __name__ == "__main__":
    key = jax.random.PRNGKey(0)
    k_param, k_small, k_big, k_multi = jax.random.split(key, 4)

    hidden_dim = 32
    output_dim = 4
    params = init_params(k_param, hidden_dim, output_dim)

    # 1) Tiny batch (typical single ODE-RHS evaluation): routed to the
    #    fused-XLA fallback — the kernel is strictly slower at B=8.
    t_small = jax.random.uniform(k_small, (8, 1), jnp.float32)
    out_small = odefunc_forward(t_small, params)
    jax.block_until_ready(out_small)
    assert out_small.shape == (8, output_dim)
    assert jnp.allclose(out_small, odefunc_reference(t_small, params),
                        atol=1e-5, rtol=1e-5)

    # 2) Same tiny batch FORCED through the Pallas kernel (exercises the
    #    minimum-tile path: tb=8, lane-padded output, grid=(1,)).
    out_small_k = odefunc_forward(t_small, params, min_pallas_batch=0)
    jax.block_until_ready(out_small_k)
    assert out_small_k.shape == (8, output_dim)
    assert jnp.allclose(out_small_k, odefunc_reference(t_small, params),
                        atol=1e-5, rtol=1e-5)

    # 3) Large batch of time points in ONE grid step (tb = 1024 <= 2048):
    #    resident weights, lane-dense (1024, 128) output slab, no masked stores.
    t_big = jax.random.uniform(k_big, (1024, 1), jnp.float32)
    out_big = odefunc_forward(t_big, params)
    jax.block_until_ready(out_big)
    assert out_big.shape == (1024, output_dim)
    assert jnp.allclose(out_big, odefunc_reference(t_big, params),
                        atol=1e-5, rtol=1e-5)

    # 4) Multi-step grid with batch padding (B=4100 -> 3 steps of 2048 rows),
    #    verifying the pad/slice path.
    t_multi = jax.random.uniform(k_multi, (4100, 1), jnp.float32)
    out_multi = odefunc_forward(t_multi, params)
    jax.block_until_ready(out_multi)
    assert out_multi.shape == (4100, output_dim)
    assert jnp.allclose(out_multi, odefunc_reference(t_multi, params),
                        atol=1e-5, rtol=1e-5)

    # Note: this ODEFunc's RHS depends only on t (not on the state), so all
    # RK-stage evaluations of a solver step can simply be batched through this
    # kernel (one pallas_call for all stages/time points), which is exactly the
    # large-batch path above.
    # TODO(synk): if the RHS ever depends on state, move the RK stage loop
    # inside one pallas_call (lax.fori_loop with weights resident in VMEM and
    # input_output_aliases for in-place state update) to amortize dispatch.

    print("KERNEL_OK")
</pallas_src>

<mosaic_0001>
module attributes {stable_mosaic.version = 11 : i64} {
  func.func @odefunc_kernel(%arg0: i32, %arg1: memref<8x1xf32, #tpu.memory_space<vmem>>, %arg2: memref<1x32xf32, #tpu.memory_space<vmem>>, %arg3: memref<1x32xf32, #tpu.memory_space<vmem>>, %arg4: memref<32x32xf32, #tpu.memory_space<vmem>>, %arg5: memref<1x32xf32, #tpu.memory_space<vmem>>, %arg6: memref<32x128xf32, #tpu.memory_space<vmem>>, %arg7: memref<1x128xf32, #tpu.memory_space<vmem>>, %arg8: memref<8x128xf32, #tpu.memory_space<vmem>>) attributes {dimension_semantics = [#tpu.dimension_semantics<arbitrary>], iteration_bounds = array<i64: 1>, scalar_prefetch = 0 : i64, scratch_operands = 0 : i64, tpu.core_type = #tpu.core_type<tc>, window_params = [{transform_indices = @transform_0, window_bounds = array<i64: 8, 1>}, {pipeline_mode = #tpu.pipeline_mode<synchronous>, transform_indices = @transform_1, window_bounds = array<i64: 1, 32>}, {pipeline_mode = #tpu.pipeline_mode<synchronous>, transform_indices = @transform_2, window_bounds = array<i64: 1, 32>}, {pipeline_mode = #tpu.pipeline_mode<synchronous>, transform_indices = @transform_3, window_bounds = array<i64: 32, 32>}, {pipeline_mode = #tpu.pipeline_mode<synchronous>, transform_indices = @transform_4, window_bounds = array<i64: 1, 32>}, {pipeline_mode = #tpu.pipeline_mode<synchronous>, transform_indices = @transform_5, window_bounds = array<i64: 32, 128>}, {pipeline_mode = #tpu.pipeline_mode<synchronous>, transform_indices = @transform_6, window_bounds = array<i64: 1, 128>}, {transform_indices = @transform_7, window_bounds = array<i64: 8, 128>}]} {
    %c0 = arith.constant 0 : index
    %c0_0 = arith.constant 0 : index
    %0 = vector.load %arg1[%c0, %c0_0] : memref<8x1xf32, #tpu.memory_space<vmem>>, vector<8x1xf32>
    %c0_1 = arith.constant 0 : index
    %c0_2 = arith.constant 0 : index
    %1 = vector.load %arg2[%c0_1, %c0_2] : memref<1x32xf32, #tpu.memory_space<vmem>>, vector<1x32xf32>
    %2 = vector.broadcast %0 : vector<8x1xf32> to vector<8x32xf32>
    %3 = vector.broadcast %1 : vector<1x32xf32> to vector<8x32xf32>
    %4 = arith.mulf %2, %3 : vector<8x32xf32>
    %c0_3 = arith.constant 0 : index
    %c0_4 = arith.constant 0 : index
    %5 = vector.load %arg3[%c0_3, %c0_4] : memref<1x32xf32, #tpu.memory_space<vmem>>, vector<1x32xf32>
    %6 = vector.broadcast %5 : vector<1x32xf32> to vector<8x32xf32>
    %7 = arith.addf %4, %6 : vector<8x32xf32>
    %8 = math.sin %7 : vector<8x32xf32>
    %c0_5 = arith.constant 0 : index
    %c0_6 = arith.constant 0 : index
    %9 = vector.load %arg4[%c0_5, %c0_6] : memref<32x32xf32, #tpu.memory_space<vmem>>, vector<32x32xf32>
    %cst = arith.constant dense<0.000000e+00> : vector<8x32xf32>
    %10 = tpu.matmul %8, %9, %cst {dimension_numbers = #tpu.dot_dimension_numbers<[1], [0], [0], [1], [0, 0, 1, 1], [], []>} : vector<8x32xf32>, vector<32x32xf32>, vector<8x32xf32> -> vector<8x32xf32>
    %c0_7 = arith.constant 0 : index
    %c0_8 = arith.constant 0 : index
    %11 = vector.load %arg5[%c0_7, %c0_8] : memref<1x32xf32, #tpu.memory_space<vmem>>, vector<1x32xf32>
    %12 = vector.broadcast %11 : vector<1x32xf32> to vector<8x32xf32>
    %13 = arith.addf %10, %12 : vector<8x32xf32>
    %14 = math.sin %13 : vector<8x32xf32>
    %c0_9 = arith.constant 0 : index
    %c0_10 = arith.constant 0 : index
    %15 = vector.load %arg6[%c0_9, %c0_10] : memref<32x128xf32, #tpu.memory_space<vmem>>, vector<32x128xf32>
    %cst_11 = arith.constant dense<0.000000e+00> : vector<8x128xf32>
    %16 = tpu.matmul %14, %15, %cst_11 {dimension_numbers = #tpu.dot_dimension_numbers<[1], [0], [0], [1], [0, 0, 1, 1], [], []>} : vector<8x32xf32>, vector<32x128xf32>, vector<8x128xf32> -> vector<8x128xf32>
    %c0_12 = arith.constant 0 : index
    %c0_13 = arith.constant 0 : index
    %17 = vector.load %arg7[%c0_12, %c0_13] : memref<1x128xf32, #tpu.memory_space<vmem>>, vector<1x128xf32>
    %18 = vector.broadcast %17 : vector<1x128xf32> to vector<8x128xf32>
    %19 = arith.addf %16, %18 : vector<8x128xf32>
    %c0_14 = arith.constant 0 : index
    %c0_15 = arith.constant 0 : index
    %20 = vector.load %arg8[%c0_14, %c0_15] : memref<8x128xf32, #tpu.memory_space<vmem>>, vector<8x128xf32>
    tpu.vector_store %arg8[%c0_14, %c0_15], %19 {strides = array<i32>} : memref<8x128xf32, #tpu.memory_space<vmem>>, vector<8x128xf32>,
    return
  }
  func.func @transform_0(%arg0: i32) -> (i32, i32) {
    %c0_i32 = arith.constant 0 : i32
    %c0_i32_0 = arith.constant 0 : i32
    return %arg0, %c0_i32 : i32, i32
  }
  func.func @transform_1(%arg0: i32) -> (i32, i32) {
    %c0_i32 = arith.constant 0 : i32
    %c0_i32_0 = arith.constant 0 : i32
    %c0_i32_1 = arith.constant 0 : i32
    return %c0_i32, %c0_i32_0 : i32, i32
  }
  func.func @transform_2(%arg0: i32) -> (i32, i32) {
    %c0_i32 = arith.constant 0 : i32
    %c0_i32_0 = arith.constant 0 : i32
    %c0_i32_1 = arith.constant 0 : i32
    return %c0_i32, %c0_i32_0 : i32, i32
  }
  func.func @transform_3(%arg0: i32) -> (i32, i32) {
    %c0_i32 = arith.constant 0 : i32
    %c0_i32_0 = arith.constant 0 : i32
    %c0_i32_1 = arith.constant 0 : i32
    return %c0_i32, %c0_i32_0 : i32, i32
  }
  func.func @transform_4(%arg0: i32) -> (i32, i32) {
    %c0_i32 = arith.constant 0 : i32
    %c0_i32_0 = arith.constant 0 : i32
    %c0_i32_1 = arith.constant 0 : i32
    return %c0_i32, %c0_i32_0 : i32, i32
  }
  func.func @transform_5(%arg0: i32) -> (i32, i32) {
    %c0_i32 = arith.constant 0 : i32
    %c0_i32_0 = arith.constant 0 : i32
    %c0_i32_1 = arith.constant 0 : i32
    return %c0_i32, %c0_i32_0 : i32, i32
  }
  func.func @transform_6(%arg0: i32) -> (i32, i32) {
    %c0_i32 = arith.constant 0 : i32
    %c0_i32_0 = arith.constant 0 : i32
    %c0_i32_1 = arith.constant 0 : i32
    return %c0_i32, %c0_i32_0 : i32, i32
  }
  func.func @transform_7(%arg0: i32) -> (i32, i32) {
    %c0_i32 = arith.constant 0 : i32
    %c0_i32_0 = arith.constant 0 : i32
    return %arg0, %c0_i32 : i32, i32
  }
}

</mosaic_0001>

<bundles_post_ra>
// kernel: tpu_custom_call.1
= control target key start
LH: loop header
LB: loop body
LE: loop exit
PB: predicated region body
PF: predicated region fallthrough
CT: control target
= control target key end

     0   :  { %12 = vsyncpa [#allocation3], 0  ;;  %s809_s0 = inlined_call_operand.vmem [shape: f32[8,1], index: 0, kind: input, shape index: {}]   ;;  %s810_s1 = inlined_call_operand.vmem [shape: f32[1,32], index: 1, kind: input, shape index: {}]   ;;  %s811_s2 = inlined_call_operand.vmem [shape: f32[1,32], index: 2, kind: input, shape index: {}]   ;;  %s812_s3 = inlined_call_operand.hbm [shape: f32[32,32], index: 3, kind: input, shape index: {}]   ;;  %s813_s4 = inlined_call_operand.vmem [shape: f32[1,32], index: 4, kind: input, shape index: {}]   ;;  %s814_s5 = inlined_call_operand.hbm [shape: f32[32,128], index: 5, kind: input, shape index: {}]   ;;  %s815_s6 = inlined_call_operand.vmem [shape: f32[1,128], index: 6, kind: input, shape index: {}]   ;;  %s816_s7 = inlined_call_operand.hbm [shape: f32[8,128], index: 7, kind: output, shape index: {}]  }
   0x1   :  { %13 = vsyncpa [#allocation6], 0 }
   0x2   :  { %14 = vsyncpa [#allocation4], 0  ;;  %s633_s24 = smov [#allocation2]   ;;  %s561_s28 = scalar_lea.hbm %s812_s3, 512 }
   0x3   :  { %s26_s25 = sshll.u32 %s633_s24, 4  ;;  %p562_p0 = scmp.ne.s32.totalorder %s812_s3, %s561_s28  ;;  %s27_s25 = int_to_ptr.vmem [resolvable:$true] %s26_s25 }
   0x4   :  { %p565_p1 = scmp.lt.u32.totalorder %s561_s28, %s812_s3 }
   0x6   :  { %p567_p2 = pnand %p565_p1, %p562_p0 }
   0x8   :  { %570 = shalt.err (!%p567_p2)
}
   0x9   :  { %s571_s10 = scalar_lea.vmem %s27_s25, 512  ;;  %p576_p4 = scmp.lt.s32.totalorder %s27_s25, %s27_s25 }
   0xa   :  { %p572_p3 = scmp.ne.s32.totalorder %s27_s25, %s571_s10  ;;  %p577_p5 = scmp.lt.s32.totalorder %s571_s10, %s571_s10 }
   0xc   :  { %p578_p6 = por %p577_p5, %p576_p4 }
   0xe   :  { %p579_p7 = pnand %p578_p6, %p572_p3 }
  0x10   :  { %582 = shalt.err (!%p579_p7)
}
  0x11   :  { %s634_s11 = smov 128   ;;  %s635_s12 = smov 8  }
  0x12   :  { %32 = dma.hbm_to_vmem [thread:$0]  %s812_s3, 512, %s27_s25, [#allocation3], %s634_s11, %s634_s11, %s635_s12  }
  0x13   :  { %s636_s15 = smov [#allocation5]   ;;  %s583_s19 = scalar_lea.hbm %s814_s5, 512 }
  0x14   :  { %s40_s16 = sshll.u32 %s636_s15, 4  ;;  %p584_p8 = scmp.ne.s32.totalorder %s814_s5, %s583_s19  ;;  %s41_s16 = int_to_ptr.vmem [resolvable:$true] %s40_s16 }
  0x15   :  { %p587_p9 = scmp.lt.u32.totalorder %s583_s19, %s814_s5 }
  0x17   :  { %p589_p10 = pnand %p587_p9, %p584_p8 }
  0x19   :  { %592 = shalt.err (!%p589_p10)
}
  0x1a   :  { %s593_s24 = scalar_lea.vmem %s41_s16, 512  ;;  %p598_p12 = scmp.lt.s32.totalorder %s41_s16, %s41_s16 }
  0x1b   :  { %p594_p11 = scmp.ne.s32.totalorder %s41_s16, %s593_s24  ;;  %p599_p13 = scmp.lt.s32.totalorder %s593_s24, %s593_s24 }
  0x1d   :  { %p600_p0 = por %p599_p13, %p598_p12 }
  0x1f   :  { %p601_p1 = pnand %p600_p0, %p594_p11 }
  0x21   :  { %604 = shalt.err (!%p601_p1)
}
  0x22   :  { %46 = dma.hbm_to_vmem [thread:$0]  %s814_s5, 512, %s41_s16, [#allocation6], %s634_s11, %s634_s11, %s635_s12  }
  0x23   :  { %627 = dma.done.wait [#allocation3], 512  }
  0x24   :  { %628 = vsyncadd [#allocation3], 4294966784 }
  0x25   :  { %629 = dma.done.wait [#allocation6], 512  }
  0x26   :  { %630 = vsyncadd [#allocation6], 4294966784  ;;  %v637_v0 = vmov 0   ;;  %v55_v1 = vld [vmem:[%s809_s0] sm:$0xff]  ;;  %v182_v3 = vld [vmem:[#allocation2 + $0x8] sm:$0xff]  ;;  %v638_v5 = vmov 0.0|0.0  }
  0x27   :  { %552 = vset.pattern.permute.xlu0 %v637_v0  ;;  %v181_v2 = vld [vmem:[#allocation2] sm:$0xff]  ;;  %v183_v4 = vld [vmem:[#allocation2 + $0x10] sm:$0xff]  ;;  %517 = vmatprep.subr.bf16.mxu0 %v638_v5  ;;  %v184_v7 = vld [vmem:[#allocation2 + $0x18] sm:$0xff]  ;;  %vm639_vm0 = vmmov 0   ;;  %v640_v8 = vmov 0.0   ;;  %vm192_vm13 = vcmask 261120  }
  0x28   :  { %59 = vperm.xlu0 %552, %v55_v1   ;;  %v518_v6 = vpack.c.bf16 %v182_v3, %v181_v2  ;;  %503 = vmatprep.mubr.msk.f32.mxu0 %vm639_vm0, %v640_v8  ;;  %v521_v9 = vpack.c.bf16 %v184_v7, %v183_v4  ;;  %v471_v10 = vld [vmem:[%s810_s1] ss:$0 sm:$0xff]  ;;  %v641_v26 = vmov 2102212464   ;;  %v642_v28 = vmov 920167782  }
  0x29   :  { %523 = vmatprep.subr.bf16.mxu1 %v638_v5  ;;  %514 = vmatprep.mubr.msk.f32.mxu1 %vm639_vm0, %v640_v8  ;;  %v472_v11 = vld [vmem:[%s811_s2] ss:$0 sm:$0xff]  ;;  %v643_v32 = vmov 1326507024   ;;  %v644_v34 = vmov 683565275  }
  0x2a   :  { %519 = vmatpush3.bf16.msra.mxu0 %v518_v6  ;;  %v645_v36 = vmov 2475754826   ;;  %v646_v39 = vmov 2131351028   ;;  %s647_s8 = smov [#allocation7]  }
  0x2b   :  { %520 = vmatprep.subr.bf16.mxu0 %v638_v5  ;;  %s461_s9 = sshll.u32 %s647_s8, 4  ;;  %s462_s9 = int_to_ptr.vmem [resolvable:$true] %s461_s9 }
  0x2c   :  { %s605_s10 = scalar_lea.vmem %s462_s9, 128  ;;  %p610_p3 = scmp.lt.s32.totalorder %s462_s9, %s462_s9 }
  0x2d   :  { %p606_p2 = scmp.ne.s32.totalorder %s462_s9, %s605_s10  ;;  %p611_p4 = scmp.lt.s32.totalorder %s605_s10, %s605_s10 }
  0x2e   :  { %522 = vmatpush3.bf16.msra.mxu0 %v521_v9 }
  0x2f   :  { %p612_p5 = por %p611_p4, %p610_p3 }
  0x31   :  { %p613_p6 = pnand %p612_p5, %p606_p2 }
  0xa7   :  { %v60_v12 = vpop.permute.xlu0 %59 }
  0xa8   :  { %v68_v13 = vmul.f32 %v471_v10, %v60_v12 }
  0xaa   :  { %v724_v14 = vadd.f32 %v472_v11, %v68_v13 }
  0xac   :  { %v80_v15 = vand.u32 2139095040, %v724_v14  ;;  %v77_v16 = vand.u32 2147483647, %v724_v14  ;;  %vm79_vm8 = vcmp.lt.s32.totalorder %v724_v14, 0  ;;  %vm169_vm14 = vweird.f32 %v724_v14 }
  0xae   :  { %v81_v17 = vshrl.u32 %v80_v15, 23  ;;  %v84_v19 = vand.u32 8388607, %v77_v16  ;;  %vm78_vm9 = vcmp.le.f32.partialorder %v77_v16, 0.7853982 }
  0xb0   :  { %v473_v18 = vadd.s32 4294967169, %v81_v17  ;;  %v85_v22 = vor.u32 8388608, %v84_v19 }
  0xb2   :  { %v87_v20 = vadd.s32 1, %v473_v18  ;;  %v125_v30 = vshll.u32 %v85_v22, 8 }
  0xb4   :  { %vm88_vm1 = vcmp.gt.s32.totalorder %v87_v20, 0 }
  0xb5   :  { %v89_v21 = vsel %vm88_vm1, %v87_v20, 0 }
  0xb6   :  { %v91_v23 = vand.u32 31, %v89_v21  ;;  %v90_v24 = vshrl.u32 %v89_v21, 5 }
  0xb8   :  { %v92_v25 = vsub.s32 32, %v91_v23  ;;  %v103_v27 = vshll.u32 %v641_v26, %v91_v23  ;;  %v106_v29 = vshll.u32 %v642_v28, %v91_v23  ;;  %v94_v35 = vshll.u32 %v644_v34, %v91_v23 }
  0xb9   :  { %v97_v38 = vshll.u32 %v645_v36, %v91_v23  ;;  %v100_v41 = vshll.u32 %v646_v39, %v91_v23  ;;  %vm112_vm2 = vcmp.lt.s32.totalorder %v90_v24, 4  ;;  %vm109_vm3 = vcmp.lt.s32.totalorder %v90_v24, 1 }
  0xba   :  { %v104_v31 = vshrl.u32 %v642_v28, %v92_v25  ;;  %v107_v33 = vshrl.u32 %v643_v32, %v92_v25  ;;  %v95_v37 = vshrl.u32 %v645_v36, %v92_v25  ;;  %v98_v40 = vshrl.u32 %v646_v39, %v92_v25 }
  0xbb   :  { %v101_v42 = vshrl.u32 %v641_v26, %v92_v25  ;;  %v93_v46 = vshrl.u32 %v644_v34, %v92_v25  ;;  %vm110_vm4 = vcmp.lt.s32.totalorder %v90_v24, 2  ;;  %vm111_vm5 = vcmp.lt.s32.totalorder %v90_v24, 3 }
  0xbc   :  { %v105_v43 = vor.u32 %v104_v31, %v103_v27  ;;  %v108_v44 = vor.u32 %v107_v33, %v106_v29  ;;  %v96_v45 = vor.u32 %v95_v37, %v94_v35  ;;  %v99_v47 = vor.u32 %v98_v40, %v97_v38 }
  0xbd   :  { %v102_v48 = vor.u32 %v101_v42, %v100_v41 }
  0xbe   :  { %v118_v49 = vsel %vm112_vm2, %v105_v43, 920167782  ;;  %v122_v50 = vsel %vm112_vm2, %v108_v44, 1326507024  ;;  %v117_v52 = vsel %vm109_vm3, %v96_v45, %v99_v47  ;;  %v113_v55 = vsel %vm109_vm3, %v93_v46, %v96_v45 }
  0xbf   :  { %v114_v51 = vsel %vm112_vm2, %v102_v48, 2102212464  ;;  %v119_v53 = vsel %vm111_vm5, %v102_v48, %v118_v49  ;;  %v121_v54 = vsel %vm109_vm3, %v99_v47, %v102_v48  ;;  %v123_v58 = vsel %vm111_vm5, %v105_v43, %v122_v50  ;;  %v370_v50 = vld [vmem:[#allocation5] sm:$0xff] }
  0xc0   :  { %v115_v56 = vsel %vm111_vm5, %v99_v47, %v114_v51  ;;  %v120_v57 = vsel %vm110_vm4, %v117_v52, %v119_v53  ;;  %v124_v59 = vsel %vm110_vm4, %v121_v54, %v123_v58  ;;  %v371_v51 = vld [vmem:[#allocation5 + $0x8] sm:$0xff]  ;;  %v372_v52 = vld [vmem:[#allocation5 + $0x10] sm:$0xff]  ;;  %v373_v54 = vld [vmem:[#allocation5 + $0x18] sm:$0xff] }
  0xc1   :  { %v741_v60 = vmul.u32.u64.low %v125_v30, %v120_v57  ;;  %v742_v61 = vmul.u32.u64.high %v125_v30, %v120_v57, %v741_v60  ;;  %v744_v62 = vmul.u32.u64.low %v125_v30, %v124_v59  ;;  %v745_v63 = vmul.u32.u64.high %v125_v30, %v124_v59, %v744_v62 }
  0xc2   :  { %v116_v0 = vsel %vm110_vm4, %v113_v55, %v115_v56  ;;  %v524_v53 = vpack.c.bf16 %v371_v51, %v370_v50  ;;  %v527_v55 = vpack.c.bf16 %v373_v54, %v372_v52  ;;  %v477_v56 = vld [vmem:[%s813_s4] ss:$0 sm:$0xff] }
  0xc3   :  { %v135_v1 = vadd.s32 1, %v742_v61  ;;  %v132_v2 = vmul.u32 %v125_v30, %v116_v0  ;;  %vm134_vm6 = vc.u32 %v745_v63, %v741_v60  ;;  %v133_v17 = vadd.s32 %v741_v60, %v745_v63 }
  0xc4   :  { %525 = vmatpush3.bf16.msra.mxu1 %v524_v53 }
  0xc5   :  { %v136_v3 = vsel %vm134_vm6, %v135_v1, %v742_v61  ;;  %526 = vmatprep.subr.bf16.mxu1 %v638_v5 }
  0xc6   :  { %v137_v4 = vadd.s32 %v136_v3, %v132_v2 }
  0xc8   :  { %v138_v6 = vadd.s32 536870912, %v137_v4  ;;  %528 = vmatpush3.bf16.msra.mxu1 %v527_v55 }
  0xca   :  { %v139_v7 = vshrl.u32 %v138_v6, 30 }
  0xcc   :  { %v140_v8 = vshll.u32 %v139_v7, 30  ;;  %v163_v31 = vsub.s32 4, %v139_v7 }
  0xce   :  { %v141_v9 = vsub.s32 %v137_v4, %v140_v8  ;;  %v164_v37 = vsel %vm79_vm8, %v163_v31, %v139_v7 }
  0xcf   :  { %v166_v40 = vsel %vm78_vm9, 0, %v164_v37 }
  0xd0   :  { %v143_v10 = vsub.s32 0, %v141_v9  ;;  %v170_v41 = vadd.s32 3, %v166_v40 }
  0xd2   :  { %v474_v11 = vmin.u32 %v143_v10, %v141_v9  ;;  %v171_v42 = vand.u32 3, %v170_v41 }
  0xd4   :  { %v145_v12 = vclz %v474_v11  ;;  %vm176_vm10 = vcmp.eq.s32.totalorder %v171_v42, 2  ;;  %vm173_vm11 = vcmp.eq.s32.totalorder %v171_v42, 0  ;;  %vm172_vm12 = vcmp.lt.s32.totalorder %v171_v42, 2 }
  0xd6   :  { %v475_v13 = vadd.s32 4294967294, %v145_v12 }
  0xd8   :  { %vm476_vm7 = vcmp.lt.s32.totalorder %v475_v13, 0 }
  0xd9   :  { %v148_v15 = vsel %vm476_vm7, 0, %v475_v13 }
  0xda   :  { %v149_v18 = vsub.s32 32, %v148_v15  ;;  %v153_v19 = vsub.s32 4294967266, %v148_v15  ;;  %v150_v20 = vshll.u32 %v141_v9, %v148_v15 }
  0xdc   :  { %v151_v21 = vshrl.u32 %v133_v17, %v149_v18  ;;  %v154_v22 = vadd.s32 127, %v153_v19 }
  0xde   :  { %v152_v23 = vor.u32 %v151_v21, %v150_v20  ;;  %v155_v24 = vshll.u32 %v154_v22, 23 }
  0xe0   :  { %v156_v25 = vor.u32 4788187, %v155_v24  ;;  %v159_v29 = vcvt.s32.f32 %v152_v23 }
  0xe2   :  { %v157_v27 = vand.u32 2147483647, %v156_v25 }
  0xe4   :  { %v160_v30 = vmul.f32 %v159_v29, %v157_v27 }
  0xe6   :  { %v161_v33 = vxor.u32 2147483648, %v160_v30 }
  0xe8   :  { %v162_v35 = vsel %vm79_vm8, %v161_v33, %v160_v30 }
  0xe9   :  { %v165_v38 = vsel %vm78_vm9, %v724_v14, %v162_v35 }
  0xea   :  { %553 = vcosq.f32 %v165_v38 }
  0xeb   :  { %555 = vsinq.f32 %v165_v38 }
  0xf4   :  { %v554_v43 = vpop.eup %553 }
  0xf5   :  { %v556_v44 = vpop.eup %555  ;;  %v177_v45 = vxor.u32 2147483648, %v554_v43 }
  0xf6   :  { %v174_v46 = vxor.u32 2147483648, %v556_v44 }
  0xf7   :  { %v178_v47 = vsel %vm176_vm10, %v177_v45, %v556_v44 }
  0xf8   :  { %v175_v48 = vsel %vm173_vm11, %v554_v43, %v174_v46 }
  0xf9   :  { %v179_v16 = vsel %vm172_vm12, %v175_v48, %v178_v47 }
  0xfa   :  { %v180_v49 = vsel %vm169_vm14, nan, %v179_v16 }
  0xfb   :  { %504 = vmatmul.mubr.msk.f32.vlgmr.msra.gmra.mrb[0].mxu0 %vm192_vm13, %v180_v49 }
 0x1ce   :  { %v262_v57 = vpop.f32.mrb[0].mxu0 }
 0x1cf   :  { %v761_v14 = vadd.f32 %v477_v56, %v262_v57  ;;  %v505_v58 = vpop.f32.mrb[1].mxu0 }
 0x1d1   :  { %v269_v59 = vand.u32 2139095040, %v761_v14  ;;  %v266_v63 = vand.u32 2147483647, %v761_v14  ;;  %vm268_vm6 = vcmp.lt.s32.totalorder %v761_v14, 0  ;;  %vm358_vm11 = vweird.f32 %v761_v14 }
 0x1d3   :  { %v270_v60 = vshrl.u32 %v269_v59, 23  ;;  %v273_v5 = vand.u32 8388607, %v266_v63  ;;  %vm267_vm7 = vcmp.le.f32.partialorder %v266_v63, 0.7853982 }
 0x1d5   :  { %v479_v61 = vadd.s32 4294967169, %v270_v60  ;;  %v274_v17 = vor.u32 8388608, %v273_v5 }
 0x1d7   :  { %v276_v62 = vadd.s32 1, %v479_v61 }
 0x1d9   :  { %vm277_vm15 = vcmp.gt.s32.totalorder %v276_v62, 0 }
 0x1da   :  { %v278_v0 = vsel %vm277_vm15, %v276_v62, 0 }
 0x1db   :  { %v280_v1 = vand.u32 31, %v278_v0  ;;  %v279_v3 = vshrl.u32 %v278_v0, 5 }
 0x1dd   :  { %v281_v2 = vsub.s32 32, %v280_v1  ;;  %v283_v4 = vshll.u32 %v644_v34, %v280_v1  ;;  %v286_v6 = vshll.u32 %v645_v36, %v280_v1  ;;  %v289_v9 = vshll.u32 %v646_v39, %v280_v1 }
 0x1de   :  { %v292_v11 = vshll.u32 %v641_v26, %v280_v1  ;;  %v295_v13 = vshll.u32 %v642_v28, %v280_v1  ;;  %vm298_vm0 = vcmp.lt.s32.totalorder %v279_v3, 1  ;;  %vm301_vm1 = vcmp.lt.s32.totalorder %v279_v3, 4 }
 0x1df   :  { %v284_v7 = vshrl.u32 %v645_v36, %v281_v2  ;;  %v287_v8 = vshrl.u32 %v646_v39, %v281_v2  ;;  %v290_v10 = vshrl.u32 %v641_v26, %v281_v2  ;;  %v293_v12 = vshrl.u32 %v642_v28, %v281_v2 }
 0x1e0   :  { %v296_v15 = vshrl.u32 %v643_v32, %v281_v2  ;;  %v282_v24 = vshrl.u32 %v644_v34, %v281_v2  ;;  %vm300_vm2 = vcmp.lt.s32.totalorder %v279_v3, 3  ;;  %vm299_vm3 = vcmp.lt.s32.totalorder %v279_v3, 2 }
 0x1e1   :  { %v285_v18 = vor.u32 %v284_v7, %v283_v4  ;;  %v288_v19 = vor.u32 %v287_v8, %v286_v6  ;;  %v291_v20 = vor.u32 %v290_v10, %v289_v9  ;;  %v294_v21 = vor.u32 %v293_v12, %v292_v11 }
 0x1e2   :  { %v297_v36 = vor.u32 %v296_v15, %v295_v13  ;;  %v314_v32 = vshll.u32 %v274_v17, 8 }
 0x1e3   :  { %v303_v22 = vsel %vm301_vm1, %v291_v20, 2102212464  ;;  %v306_v39 = vsel %vm298_vm0, %v285_v18, %v288_v19  ;;  %v310_v23 = vsel %vm298_vm0, %v288_v19, %v291_v20  ;;  %v307_v26 = vsel %vm301_vm1, %v294_v21, 920167782 }
 0x1e4   :  { %v311_v25 = vsel %vm301_vm1, %v297_v36, 1326507024  ;;  %v308_v28 = vsel %vm300_vm2, %v291_v20, %v307_v26  ;;  %v302_v29 = vsel %vm298_vm0, %v282_v24, %v285_v18  ;;  %v304_v30 = vsel %vm300_vm2, %v288_v19, %v303_v22  ;;  %v483_v19 = vld [vmem:[%s815_s6] ss:$0 sm:$0xff] }
 0x1e5   :  { %v312_v27 = vsel %vm300_vm2, %v294_v21, %v311_v25  ;;  %v309_v31 = vsel %vm299_vm3, %v306_v39, %v308_v28  ;;  %v305_v41 = vsel %vm299_vm3, %v302_v29, %v304_v30 }
 0x1e6   :  { %v313_v33 = vsel %vm299_vm3, %v310_v23, %v312_v27  ;;  %v781_v38 = vmul.u32.u64.low %v314_v32, %v309_v31  ;;  %v782_v40 = vmul.u32.u64.high %v314_v32, %v309_v31, %v781_v38  ;;  %v321_v42 = vmul.u32 %v314_v32, %v305_v41 }
 0x1e7   :  { %v778_v35 = vmul.u32.u64.low %v314_v32, %v313_v33  ;;  %v779_v37 = vmul.u32.u64.high %v314_v32, %v313_v33, %v778_v35 }
 0x1e8   :  { %v324_v34 = vadd.s32 1, %v782_v40 }
 0x1e9   :  { %vm323_vm4 = vc.u32 %v779_v37, %v781_v38  ;;  %v322_v53 = vadd.s32 %v781_v38, %v779_v37 }
 0x1ea   :  { %v325_v43 = vsel %vm323_vm4, %v324_v34, %v782_v40 }
 0x1eb   :  { %v326_v44 = vadd.s32 %v325_v43, %v321_v42 }
 0x1ed   :  { %v327_v45 = vadd.s32 536870912, %v326_v44 }
 0x1ef   :  { %v328_v46 = vshrl.u32 %v327_v45, 30 }
 0x1f1   :  { %v329_v47 = vshll.u32 %v328_v46, 30  ;;  %v352_v5 = vsub.s32 4, %v328_v46 }
 0x1f3   :  { %v330_v48 = vsub.s32 %v326_v44, %v329_v47  ;;  %v353_v4 = vsel %vm268_vm6, %v352_v5, %v328_v46 }
 0x1f4   :  { %v355_v7 = vsel %vm267_vm7, 0, %v353_v4 }
 0x1f5   :  { %v332_v16 = vsub.s32 0, %v330_v48  ;;  %v359_v8 = vadd.s32 3, %v355_v7 }
 0x1f7   :  { %v480_v49 = vmin.u32 %v332_v16, %v330_v48  ;;  %v360_v9 = vand.u32 3, %v359_v8 }
 0x1f9   :  { %v334_v50 = vclz %v480_v49  ;;  %vm365_vm8 = vcmp.eq.s32.totalorder %v360_v9, 2  ;;  %vm362_vm9 = vcmp.eq.s32.totalorder %v360_v9, 0  ;;  %vm361_vm10 = vcmp.lt.s32.totalorder %v360_v9, 2 }
 0x1fb   :  { %v481_v51 = vadd.s32 4294967294, %v334_v50 }
 0x1fd   :  { %vm482_vm5 = vcmp.lt.s32.totalorder %v481_v51, 0 }
 0x1fe   :  { %v337_v52 = vsel %vm482_vm5, 0, %v481_v51 }
 0x1ff   :  { %v338_v54 = vsub.s32 32, %v337_v52  ;;  %v342_v55 = vsub.s32 4294967266, %v337_v52  ;;  %v339_v56 = vshll.u32 %v330_v48, %v337_v52 }
 0x201   :  { %v340_v57 = vshrl.u32 %v322_v53, %v338_v54  ;;  %v343_v58 = vadd.s32 127, %v342_v55 }
 0x203   :  { %v341_v59 = vor.u32 %v340_v57, %v339_v56  ;;  %v344_v60 = vshll.u32 %v343_v58, 23 }
 0x205   :  { %v345_v61 = vor.u32 4788187, %v344_v60  ;;  %v348_v0 = vcvt.s32.f32 %v341_v59 }
 0x207   :  { %v346_v62 = vand.u32 2147483647, %v345_v61 }
 0x209   :  { %v349_v1 = vmul.f32 %v348_v0, %v346_v62 }
 0x20b   :  { %v350_v2 = vxor.u32 2147483648, %v349_v1 }
 0x20d   :  { %v351_v3 = vsel %vm268_vm6, %v350_v2, %v349_v1 }
 0x20e   :  { %v354_v6 = vsel %vm267_vm7, %v761_v14, %v351_v3 }
 0x20f   :  { %557 = vcosq.f32 %v354_v6 }
 0x210   :  { %559 = vsinq.f32 %v354_v6 }
 0x219   :  { %v558_v10 = vpop.eup %557 }
 0x21a   :  { %v560_v11 = vpop.eup %559  ;;  %v366_v12 = vxor.u32 2147483648, %v558_v10 }
 0x21b   :  { %v363_v13 = vxor.u32 2147483648, %v560_v11 }
 0x21c   :  { %v367_v15 = vsel %vm365_vm8, %v366_v12, %v560_v11 }
 0x21d   :  { %v364_v17 = vsel %vm362_vm9, %v558_v10, %v363_v13 }
 0x21e   :  { %v368_v63 = vsel %vm361_vm10, %v364_v17, %v367_v15 }
 0x21f   :  { %v369_v18 = vsel %vm358_vm11, nan, %v368_v63 }
 0x220   :  { %515 = vmatmul.mubr.msk.f32.vlgmr.msra.gmra.mrb[0].mxu1 %vm192_vm13, %v369_v18 }
 0x2f3   :  { %v450_v20 = vpop.f32.mrb[0].mxu1 }
 0x2f4   :  { %v451_v21 = vadd.f32 %v483_v19, %v450_v20  ;;  %v516_v36 = vpop.f32.mrb[1].mxu1 }
 0x2f6   :  { %454 = vst [vmem:[#allocation7] sm:$0xff] %v451_v21 }
 0x2f7   :  { %616 = shalt.err (!%p613_p6)
}
 0x2f8   :  { %s617_s13 = scalar_lea.hbm %s816_s7, 128 }
 0x2f9   :  { %p618_p7 = scmp.ne.s32.totalorder %s816_s7, %s617_s13  ;;  %p621_p8 = scmp.lt.u32.totalorder %s617_s13, %s816_s7 }
 0x2fb   :  { %p623_p9 = pnand %p621_p8, %p618_p7 }
 0x2fd   :  { %626 = shalt.err (!%p623_p9)
}
 0x2fe   :  { %464 = dma.vmem_to_hbm [thread:$0]  %s462_s9, 128, %s816_s7, [#allocation4]  }
 0x2ff   :  { %631 = dma.done.wait [#allocation4], 128  }
 0x300   :  { %632 = vsyncadd [#allocation4], 4294967168 }
 0x301   :  { %468 = vsyncpa [#allocation3], 1 }
 0x302   :  { %469 = vsyncpa [#allocation6], 1 }
 0x303   :  { %470 = vsyncpa [#allocation4], 1 }

</bundles_post_ra>
